<compile_context>
chip_gen: v5e
topology: v5e:2x2
jax: 0.10.0
libtpu: 0.0.40
codegen_flags: <defaults>
</compile_context>

<pallas_src>
import functools
import math

import jax
import jax.numpy as jnp
from jax import lax
from jax.experimental import pallas as pl
from jax.experimental.pallas import tpu as pltpu

_LANE = 128
_SUBLANE = 8
_NEG_FILL = -1e30                 # "never selected" fill for padded logits
_TEMP_BUDGET = 24 * 1024 * 1024   # budget for pairwise temporaries (v7x-safe)
_VMEM_LIMIT = 48 * 1024 * 1024    # scoped VMEM limit (fits v5e/v6e/v7x)
_MAX_LANE_TILE = 2048


def _round_up(a, b):
    return (a + b - 1) // b * b


def _choose_tiling(rows, n):
    """Pick (n_pad, lane_tile, j_chunk) for the transposed (n, rows) layout.

    Roughly 5 f32 copies of the (j_chunk, n_pad, lane_tile) pairwise tensors
    are live at once; keep them under _TEMP_BUDGET so the kernel fits v7x's
    64 MiB VMEM as well as v5e/v6e's 128 MiB.
    """
    n_pad = _round_up(n, _SUBLANE)
    bytes_per = 5 * 4 * n_pad            # per lane, per j-row
    j_chunk = min(n_pad, _LANE)
    if bytes_per * j_chunk * _LANE <= _TEMP_BUDGET:
        # Whole-n chunk fits at the minimum lane tile: grow the lane tile.
        lane_cap = _TEMP_BUDGET // (bytes_per * j_chunk)
        lane_cap = min(_MAX_LANE_TILE, max(_LANE, lane_cap // _LANE * _LANE))
    else:
        # Large n: keep the minimum lane tile and shrink the j-chunk instead.
        lane_cap = _LANE
        j_chunk = _TEMP_BUDGET // (bytes_per * _LANE)
        j_chunk = max(_SUBLANE, j_chunk // _SUBLANE * _SUBLANE)
    lane_tile = min(lane_cap, _round_up(max(rows, 1), _LANE))
    if rows >= 2048:
        # Keep >= ~8 grid steps for megacore sharding / pipelining once the
        # per-step work is big enough to amortize the ~0.35us step overhead.
        lane_tile = min(lane_tile, max(512, _round_up((rows + 7) // 8, _LANE)))
    n_pad = _round_up(n_pad, j_chunk)
    return n_pad, lane_tile, j_chunk


def _make_sparsemax_kernel(n_pad, j_chunk):
    num_chunks = n_pad // j_chunk
    chunked = num_chunks > 1

    def kernel(x_ref, o_ref, *scratch):
        # x_ref / o_ref: (n_pad, lane_tile); every lane is an independent row.
        z = x_ref[...].astype(jnp.float32)
        z = z - jnp.max(z, axis=0, keepdims=True)
        lanes = z.shape[1]

        def pairwise(j0, zj):
            # zj: rows j0 .. j0+j_chunk-1 of z, shape (j_chunk, lanes).
            zj3 = zj[:, None, :]                       # (cj, 1, L)
            zi3 = z[None, :, :]                        # (1, n_pad, L)
            gt = zj3 > zi3                             # (cj, n_pad, L) bool
            eq = zj3 == zi3                            # (cj, n_pad, L) bool
            # Stable tie-break mask hoisted to 2-D (cj, n_pad), not 3-D iotas.
            j_idx = lax.broadcasted_iota(jnp.int32, (j_chunk, n_pad), 0) + j0
            i_idx = lax.broadcasted_iota(jnp.int32, (j_chunk, n_pad), 1)
            tri_f = jnp.where(j_idx <= i_idx, 1.0, 0.0)[:, :, None]
            # w == 1 iff z_j sorts at or before z_i in a stable descending
            # sort (strictly greater, or equal with j <= i).
            w = jnp.where(gt, 1.0, jnp.where(eq, tri_f, 0.0))     # (cj,n,L)
            rank = jnp.sum(w, axis=0)                             # (n_pad, L)
            csum = jnp.sum(w * zj3, axis=0)                       # (n_pad, L)
            return rank, csum

        if not chunked:
            rank, csum = pairwise(0, z)
        else:
            # Large n: accumulate over j-chunks so intermediates stay
            # O(n * j_chunk * lane_tile) instead of O(n^2 * lane_tile).
            z_scr = scratch[0]
            z_scr[...] = z

            def body(c, carry):
                rank, csum = carry
                j0 = c * j_chunk
                zj = z_scr[pl.ds(pl.multiple_of(j0, j_chunk), j_chunk), :]
                dr, dc = pairwise(j0, zj)
                return rank + dr, csum + dc

            zero = jnp.zeros((n_pad, lanes), jnp.float32)
            rank, csum = lax.fori_loop(0, num_chunks, body, (zero, zero))

        # rank == 1-indexed position in a stable descending sort,
        # csum == cumulative sum of the sorted sequence at that position.
        is_gt = (1.0 + rank * z) > csum
        k = jnp.max(jnp.where(is_gt, rank, 0.0), axis=0, keepdims=True)
        ssum = jnp.sum(jnp.where(is_gt, z, 0.0), axis=0, keepdims=True)
        taus = (ssum - 1.0) / k
        o_ref[...] = jnp.maximum(z - taus, 0.0).astype(o_ref.dtype)

    return kernel


@functools.partial(jax.jit, static_argnames=("dim",))
def sparsemax(x, dim=-1):
    """Sparsemax along axis `dim` (matches the PyTorch Sparsemax.forward)."""
    orig_dtype = x.dtype
    x_last = jnp.moveaxis(x, dim, -1)
    moved_shape = x_last.shape
    n = moved_shape[-1]
    rows = math.prod(moved_shape[:-1])

    n_pad, lane_tile, j_chunk = _choose_tiling(rows, n)
    rows_pad = _round_up(max(rows, 1), lane_tile)

    # Rows on lanes (minor axis): lane-dense compute and lane-dense stores.
    # Input keeps its original dtype (bf16 stays bf16 on the DMA path).
    xt = x_last.reshape(rows, n).T                       # (n, rows)
    if n_pad != n:
        # Padded logits behave as "never selected" (strictly below all reals).
        xt = jnp.pad(xt, ((0, n_pad - n), (0, 0)), constant_values=_NEG_FILL)
    if rows_pad != rows:
        xt = jnp.pad(xt, ((0, 0), (0, rows_pad - rows)))

    scratch = ([pltpu.VMEM((n_pad, lane_tile), jnp.float32)]
               if n_pad // j_chunk > 1 else [])

    out_t = pl.pallas_call(
        _make_sparsemax_kernel(n_pad, j_chunk),
        out_shape=jax.ShapeDtypeStruct((n_pad, rows_pad), orig_dtype),
        grid_spec=pltpu.PrefetchScalarGridSpec(
            num_scalar_prefetch=0,
            grid=(rows_pad // lane_tile,),
            in_specs=[pl.BlockSpec((n_pad, lane_tile), lambda i: (0, i))],
            out_specs=pl.BlockSpec((n_pad, lane_tile), lambda i: (0, i)),
            scratch_shapes=scratch),
        compiler_params=pltpu.CompilerParams(
            dimension_semantics=("parallel",),
            vmem_limit_bytes=_VMEM_LIMIT),
    )(xt)

    out = out_t[:n, :rows].T.reshape(moved_shape)
    return jnp.moveaxis(out, -1, dim)


def _sparsemax_reference(x, dim=-1):
    """Pure-JAX reference following the torch code (sort + cumsum)."""
    x_last = jnp.moveaxis(x, dim, -1).astype(jnp.float32)
    z = x_last - jnp.max(x_last, axis=-1, keepdims=True)
    n = z.shape[-1]
    zs = -jnp.sort(-z, axis=-1)  # descending
    rng = jnp.arange(1, n + 1, dtype=jnp.float32)
    bound = 1.0 + rng * zs
    csum = jnp.cumsum(zs, axis=-1)
    is_gt = (bound > csum).astype(jnp.float32)
    k = jnp.max(is_gt * rng, axis=-1, keepdims=True)
    taus = (jnp.sum(is_gt * zs, axis=-1, keepdims=True) - 1.0) / k
    out = jnp.maximum(z - taus, 0.0)
    return jnp.moveaxis(out, -1, dim)


if __name__ == "__main__":
    key = jax.random.PRNGKey(0)
    x = jax.random.normal(key, (2, 4, 16, 16), dtype=jnp.float32)

    out = jax.block_until_ready(sparsemax(x, dim=-1))
    ref = _sparsemax_reference(x, dim=-1)
    assert out.shape == x.shape and out.dtype == x.dtype
    assert jnp.allclose(out, ref, atol=1e-5, rtol=1e-5)
    # sparsemax outputs sum to 1 along the reduced axis
    assert jnp.allclose(jnp.sum(out, axis=-1), 1.0, atol=1e-4)

    # bf16 inputs stay bf16 through HBM/DMA; math is f32 inside the kernel.
    xb = x.astype(jnp.bfloat16)
    outb = jax.block_until_ready(sparsemax(xb, dim=-1))
    assert outb.shape == xb.shape and outb.dtype == jnp.bfloat16
    assert jnp.allclose(outb.astype(jnp.float32),
                        _sparsemax_reference(xb.astype(jnp.float32), dim=-1),
                        atol=3e-2)

    # Exercise a non-last dim as well (matches torch's transpose(0, dim) path).
    x2 = jax.random.normal(jax.random.PRNGKey(1), (2, 16, 4, 8), jnp.float32)
    out2 = jax.block_until_ready(sparsemax(x2, dim=1))
    assert jnp.allclose(out2, _sparsemax_reference(x2, dim=1), atol=1e-5, rtol=1e-5)

    print("KERNEL_OK")
</pallas_src>

<mosaic_0001>
module attributes {stable_mosaic.version = 11 : i64} {
  func.func @kernel(%arg0: i32, %arg1: memref<16x128xf32, #tpu.memory_space<vmem>>, %arg2: memref<16x128xf32, #tpu.memory_space<vmem>>) attributes {dimension_semantics = [#tpu.dimension_semantics<parallel>], iteration_bounds = array<i64: 1>, scalar_prefetch = 0 : i64, scratch_operands = 0 : i64, tpu.core_type = #tpu.core_type<tc>, window_params = [{transform_indices = @transform_0, window_bounds = array<i64: 16, 128>}, {transform_indices = @transform_1, window_bounds = array<i64: 16, 128>}]} {
    %c0 = arith.constant 0 : index
    %c0_0 = arith.constant 0 : index
    %0 = vector.load %arg1[%c0, %c0_0] : memref<16x128xf32, #tpu.memory_space<vmem>>, vector<16x128xf32>
    %cst = arith.constant dense<0xFF800000> : vector<128xf32>
    %1 = vector.multi_reduction <maximumf>, %0, %cst [0] : vector<16x128xf32> to vector<128xf32>
    %2 = vector.shape_cast %1 : vector<128xf32> to vector<1x128xf32>
    %3 = vector.broadcast %2 : vector<1x128xf32> to vector<16x128xf32>
    %4 = arith.subf %0, %3 : vector<16x128xf32>
    %5 = vector.shape_cast %4 : vector<16x128xf32> to vector<16x1x128xf32>
    %6 = vector.shape_cast %4 : vector<16x128xf32> to vector<1x16x128xf32>
    %7 = vector.broadcast %5 : vector<16x1x128xf32> to vector<16x16x128xf32>
    %8 = vector.broadcast %6 : vector<1x16x128xf32> to vector<16x16x128xf32>
    %9 = arith.cmpf ogt, %7, %8 : vector<16x16x128xf32>
    %10 = vector.broadcast %5 : vector<16x1x128xf32> to vector<16x16x128xf32>
    %11 = vector.broadcast %6 : vector<1x16x128xf32> to vector<16x16x128xf32>
    %12 = arith.cmpf oeq, %10, %11 : vector<16x16x128xf32>
    %13 = tpu.iota {dimensions = array<i32: 0>} : vector<16x16xi32>
    %c0_i32 = arith.constant 0 : i32
    %14 = vector.broadcast %c0_i32 : i32 to vector<16x16xi32>
    %15 = arith.addi %13, %14 : vector<16x16xi32>
    %16 = tpu.iota {dimensions = array<i32: 1>} : vector<16x16xi32>
    %17 = arith.cmpi sle, %15, %16 : vector<16x16xi32>
    %cst_1 = arith.constant 1.000000e+00 : f32
    %cst_2 = arith.constant 0.000000e+00 : f32
    %18 = vector.broadcast %cst_1 : f32 to vector<16x16xf32>
    %19 = vector.broadcast %cst_2 : f32 to vector<16x16xf32>
    %20 = arith.select %17, %18, %19 : vector<16x16xi1>, vector<16x16xf32>
    %21 = vector.shape_cast %20 : vector<16x16xf32> to vector<16x16x1xf32>
    %cst_3 = arith.constant 0.000000e+00 : f32
    %22 = vector.shape_cast %21 : vector<16x16x1xf32> to vector<16x16x1xf32>
    %23 = vector.broadcast %22 : vector<16x16x1xf32> to vector<16x16x128xf32>
    %24 = vector.broadcast %cst_3 : f32 to vector<16x16x128xf32>
    %25 = arith.select %12, %23, %24 : vector<16x16x128xi1>, vector<16x16x128xf32>
    %cst_4 = arith.constant 1.000000e+00 : f32
    %26 = vector.broadcast %cst_4 : f32 to vector<16x16x128xf32>
    %27 = arith.select %9, %26, %25 : vector<16x16x128xi1>, vector<16x16x128xf32>
    %cst_5 = arith.constant dense<0.000000e+00> : vector<16x128xf32>
    %28 = vector.multi_reduction <add>, %27, %cst_5 [0] : vector<16x16x128xf32> to vector<16x128xf32>
    %29 = vector.broadcast %5 : vector<16x1x128xf32> to vector<16x16x128xf32>
    %30 = arith.mulf %27, %29 : vector<16x16x128xf32>
    %cst_6 = arith.constant dense<0.000000e+00> : vector<16x128xf32>
    %31 = vector.multi_reduction <add>, %30, %cst_6 [0] : vector<16x16x128xf32> to vector<16x128xf32>
    %32 = arith.mulf %28, %4 : vector<16x128xf32>
    %cst_7 = arith.constant 1.000000e+00 : f32
    %33 = vector.broadcast %cst_7 : f32 to vector<16x128xf32>
    %34 = arith.addf %33, %32 : vector<16x128xf32>
    %35 = arith.cmpf ogt, %34, %31 : vector<16x128xf32>
    %cst_8 = arith.constant 0.000000e+00 : f32
    %36 = vector.broadcast %cst_8 : f32 to vector<16x128xf32>
    %37 = arith.select %35, %28, %36 : vector<16x128xi1>, vector<16x128xf32>
    %cst_9 = arith.constant dense<0xFF800000> : vector<128xf32>
    %38 = vector.multi_reduction <maximumf>, %37, %cst_9 [0] : vector<16x128xf32> to vector<128xf32>
    %39 = vector.shape_cast %38 : vector<128xf32> to vector<1x128xf32>
    %cst_10 = arith.constant 0.000000e+00 : f32
    %40 = vector.broadcast %cst_10 : f32 to vector<16x128xf32>
    %41 = arith.select %35, %4, %40 : vector<16x128xi1>, vector<16x128xf32>
    %cst_11 = arith.constant dense<0.000000e+00> : vector<128xf32>
    %42 = vector.multi_reduction <add>, %41, %cst_11 [0] : vector<16x128xf32> to vector<128xf32>
    %43 = vector.shape_cast %42 : vector<128xf32> to vector<1x128xf32>
    %cst_12 = arith.constant 1.000000e+00 : f32
    %44 = vector.broadcast %cst_12 : f32 to vector<1x128xf32>
    %45 = arith.subf %43, %44 : vector<1x128xf32>
    %46 = arith.divf %45, %39 : vector<1x128xf32>
    %47 = vector.broadcast %46 : vector<1x128xf32> to vector<16x128xf32>
    %48 = arith.subf %4, %47 : vector<16x128xf32>
    %cst_13 = arith.constant 0.000000e+00 : f32
    %49 = vector.broadcast %cst_13 : f32 to vector<16x128xf32>
    %50 = arith.maximumf %48, %49 : vector<16x128xf32>
    %c0_14 = arith.constant 0 : index
    %c0_15 = arith.constant 0 : index
    %51 = vector.load %arg2[%c0_14, %c0_15] : memref<16x128xf32, #tpu.memory_space<vmem>>, vector<16x128xf32>
    tpu.vector_store %arg2[%c0_14, %c0_15], %50 {strides = array<i32>} : memref<16x128xf32, #tpu.memory_space<vmem>>, vector<16x128xf32>,
    return
  }
  func.func @transform_0(%arg0: i32) -> (i32, i32) {
    %c0_i32 = arith.constant 0 : i32
    %c0_i32_0 = arith.constant 0 : i32
    return %c0_i32, %arg0 : i32, i32
  }
  func.func @transform_1(%arg0: i32) -> (i32, i32) {
    %c0_i32 = arith.constant 0 : i32
    %c0_i32_0 = arith.constant 0 : i32
    return %c0_i32, %arg0 : i32, i32
  }
}

</mosaic_0001>

<bundles_post_ra>
// kernel: sparsemax.1
= control target key start
LH: loop header
LB: loop body
LE: loop exit
PB: predicated region body
PF: predicated region fallthrough
CT: control target
= control target key end

     0   :  { %v131_v0 = vlaneseq  ;;  %v650_v4 = vmov 0.0   ;;  %s1072_s0 = inlined_call_operand.vmem [shape: f32[16,128], index: 0, kind: input, shape index: {}]   ;;  %s1073_s1 = inlined_call_operand.vmem [shape: f32[16,128], index: 1, kind: output, shape index: {}]  }
   0x1   :  { %v8_v31 = vld [vmem:[%s1072_s0] sm:$0xff]  ;;  %v9_v32 = vld [vmem:[%s1072_s0 + $0x8] sm:$0xff] }
   0x2   :  { %v132_v1 = vshrl.u32 %v131_v0, 7  ;;  %v135_v2 = vand.u32 127, %v131_v0  ;;  %v10_v33 = vmax.f32 %v8_v31, %v9_v32 }
   0x4   :  { %568 = vset.pattern.permute.xlu1 %v132_v1  ;;  %v133_v3 = vadd.s32 8, %v132_v1  ;;  %vm136_vm0 = vcmp.le.s32.totalorder %v132_v1, %v135_v2  ;;  %574 = vset.pattern.permute.xlu2 %v132_v1  ;;  %v11_v34 = vrot.slane %v10_v33, 4 }
   0x5   :  { %v138_v5 = vsel %vm136_vm0, 1.0, %v650_v4 }
   0x6   :  { %556 = vset.pattern.permute.xlu0 %v133_v3  ;;  %v166_v6 = vperm.slane %v138_v5, 2  ;;  %v179_v7 = vperm.slane %v138_v5, 3  ;;  %v140_v8 = vperm.slane %v138_v5, 0  ;;  %v153_v9 = vperm.slane %v138_v5, 1 }
   0x7   :  { %v192_v10 = vperm.slane %v138_v5, 4  ;;  %v205_v11 = vperm.slane %v138_v5, 5  ;;  %vm137_vm1 = vcmp.le.s32.totalorder %v133_v3, %v135_v2  ;;  %v218_v16 = vperm.slane %v138_v5, 6 }
   0x8   :  { %v569_v12 = vpack.i.bf16 %v179_v7, %v166_v6  ;;  %v557_v14 = vpack.i.bf16 %v153_v9, %v140_v8  ;;  %v139_v15 = vsel %vm137_vm1, 1.0, %v650_v4  ;;  %v231_v17 = vperm.slane %v138_v5, 7 }
   0x9   :  { %v575_v13 = vpack.i.bf16 %v205_v11, %v192_v10  ;;  %v244_v18 = vperm.slane %v139_v15, 0  ;;  %v257_v19 = vperm.slane %v139_v15, 1  ;;  %v270_v22 = vperm.slane %v139_v15, 2 }
   0xa   :  { %v598_v20 = vpack.i.bf16 %v231_v17, %v218_v16  ;;  %v283_v23 = vperm.slane %v139_v15, 3  ;;  %v296_v24 = vperm.slane %v139_v15, 4  ;;  %v309_v25 = vperm.slane %v139_v15, 5 }
   0xb   :  { %v603_v21 = vpack.i.bf16 %v257_v19, %v244_v18  ;;  %v322_v28 = vperm.slane %v139_v15, 6  ;;  %v335_v29 = vperm.slane %v139_v15, 7  ;;  %v12_v35 = vmax.f32 %v10_v33, %v11_v34 }
   0xc   :  { %570 = vperm.xlu1 %568, %v569_v12   ;;  %576 = vperm.xlu2 %574, %v575_v13   ;;  %v615_v26 = vpack.i.bf16 %v283_v23, %v270_v22  ;;  %v631_v27 = vpack.i.bf16 %v309_v25, %v296_v24 }
   0xd   :  { %v643_v30 = vpack.i.bf16 %v335_v29, %v322_v28  ;;  %v13_v36 = vrot.slane %v12_v35, 2 }
   0xe   :  { %558 = vperm.xlu0 %556, %v557_v14  }
   0xf   :  { %v14_v37 = vmax.f32 %v12_v35, %v13_v36 }
  0x11   :  { %v15_v38 = vrot.slane %v14_v37, 1 }
  0x13   :  { %v16_v39 = vmax.f32 %v14_v37, %v15_v38 }
  0x14   :  { %580 = vset.pattern.permute.xlu1 %v133_v3  ;;  %592 = vset.pattern.permute.xlu2 %v133_v3 }
  0x15   :  { %v667_v40 = vsub.f32 %v8_v31, %v16_v39  ;;  %v686_v54 = vsub.f32 %v9_v32, %v16_v39 }
  0x16   :  { %562 = vset.pattern.permute.xlu0 %v132_v1 }
  0x17   :  { %v24_v41 = vrot.slane %v667_v40, 4  ;;  %v25_v42 = vrot.slane %v667_v40, 5  ;;  %v22_v46 = vrot.slane %v667_v40, 2  ;;  %v21_v47 = vrot.slane %v667_v40, 1 }
  0x18   :  { %v23_v50 = vrot.slane %v667_v40, 3  ;;  %v689_v55 = vperm.slane %v667_v40, 0  ;;  %v27_v2 = vrot.slane %v667_v40, 7 }
  0x19   :  { %v671_v44 = vperm.slane %v24_v41, 0  ;;  %v673_v45 = vperm.slane %v25_v42, 0  ;;  %v684_v52 = vperm.slane %v22_v46, 0  ;;  %v691_v56 = vperm.slane %v21_v47, 0 }
  0x1a   :  { %v697_v59 = vperm.slane %v23_v50, 0  ;;  %vm68_vm6 = vcmp.gt.f32.partialorder %v689_v55, %v686_v54  ;;  %vm100_vm9 = vcmp.eq.f32.partialorder %v689_v55, %v686_v54  ;;  %v29_v50 = vrot.slane %v686_v54, 2 }
  0x1b   :  { %vm107_vm2 = vcmp.eq.f32.partialorder %v671_v44, %v667_v40  ;;  %vm109_vm3 = vcmp.eq.f32.partialorder %v673_v45, %v667_v40  ;;  %vm75_vm4 = vcmp.gt.f32.partialorder %v671_v44, %v667_v40  ;;  %vm77_vm5 = vcmp.gt.f32.partialorder %v673_v45, %v667_v40 }
  0x1c   :  { %582 = vperm.xlu1 %580, %v569_v12   ;;  %594 = vperm.xlu2 %592, %v575_v13   ;;  %vm103_vm7 = vcmp.eq.f32.partialorder %v684_v52, %v667_v40  ;;  %vm70_vm8 = vcmp.gt.f32.partialorder %v691_v56, %v686_v54  ;;  %vm102_vm10 = vcmp.eq.f32.partialorder %v691_v56, %v686_v54  ;;  %v747_v13 = vperm.slane %v27_v2, 0 }
  0x1d   :  { %vm76_vm11 = vcmp.gt.f32.partialorder %v671_v44, %v686_v54  ;;  %vm78_vm12 = vcmp.gt.f32.partialorder %v673_v45, %v686_v54  ;;  %vm105_vm13 = vcmp.eq.f32.partialorder %v697_v59, %v667_v40  ;;  %vm108_vm14 = vcmp.eq.f32.partialorder %v671_v44, %v686_v54 }
  0x1e   :  { %564 = vperm.xlu0 %562, %v557_v14   ;;  %vm110_vm15 = vcmp.eq.f32.partialorder %v673_v45, %v686_v54  ;;  %vm71_vm0 = vcmp.gt.f32.partialorder %v684_v52, %v667_v40  ;;  %vm72_vm1 = vcmp.gt.f32.partialorder %v684_v52, %v686_v54 }
  0x24   :  { %586 = vset.pattern.permute.xlu1 %v132_v1  ;;  %599 = vperm.xlu2 %592, %v598_v20  }
  0x26   :  { %604 = vperm.xlu0 %562, %v603_v21  }
  0x2c   :  { %588 = vperm.xlu1 %586, %v598_v20   ;;  %614 = vset.pattern.permute.xlu2 %v132_v1 }
  0x2e   :  { %630 = vset.pattern.permute.xlu0 %v133_v3 }
  0x34   :  { %608 = vset.pattern.permute.xlu1 %v133_v3  ;;  %616 = vperm.xlu2 %614, %v615_v26  }
  0x36   :  { %632 = vperm.xlu0 %630, %v631_v27  }
  0x3c   :  { %610 = vperm.xlu1 %608, %v603_v21   ;;  %626 = vperm.xlu2 %614, %v631_v27  }
  0x44   :  { %621 = vperm.xlu1 %608, %v615_v26   ;;  %642 = vset.pattern.permute.xlu2 %v133_v3 }
  0x4c   :  { %636 = vset.pattern.permute.xlu1 %v132_v1  ;;  %644 = vperm.xlu2 %642, %v643_v30   ;;  %v26_v1 = vrot.slane %v667_v40, 6 }
  0x4e   :  { %v739_v11 = vperm.slane %v26_v1, 0 }
  0x54   :  { %638 = vperm.xlu1 %636, %v643_v30  }
  0x66   :  { %v577_v43 = vpop.permute.xlu2 %576 }
  0x67   :  { %v579_v48 = vunpack.i.h.bf16 %v577_v43  ;;  %v578_v49 = vunpack.i.l.bf16 %v577_v43 }
  0x69   :  { %v356_v57 = vsel %vm107_vm2, %v578_v49, 0.0  ;;  %v358_v58 = vsel %vm109_vm3, %v579_v48, 0.0  ;;  %vm104_vm2 = vcmp.eq.f32.partialorder %v684_v52, %v686_v54  ;;  %vm67_vm3 = vcmp.gt.f32.partialorder %v689_v55, %v667_v40 }
  0x6a   :  { %v699_v61 = vsel %vm75_vm4, 1.0, %v356_v57  ;;  %v701_v62 = vsel %vm77_vm5, 1.0, %v358_v58  ;;  %vm99_vm4 = vcmp.eq.f32.partialorder %v689_v55, %v667_v40  ;;  %vm101_vm5 = vcmp.eq.f32.partialorder %v691_v56, %v667_v40 }
  0x6b   :  { %v723_v3 = vmul.f32 %v699_v61, %v671_v44  ;;  %v727_v4 = vmul.f32 %v701_v62, %v673_v45 }
  0x76   :  { %v595_v60 = vpop.permute.xlu2 %594 }
  0x77   :  { %v596_v6 = vunpack.i.l.bf16 %v595_v60  ;;  %v597_v9 = vunpack.i.h.bf16 %v595_v60 }
  0x79   :  { %v357_v19 = vsel %vm108_vm14, %v596_v6, 0.0  ;;  %v359_v20 = vsel %vm110_vm15, %v597_v9, 0.0  ;;  %vm114_vm14 = vcmp.eq.f32.partialorder %v747_v13, %v686_v54  ;;  %vm80_vm15 = vcmp.gt.f32.partialorder %v739_v11, %v686_v54 }
  0x7a   :  { %v389_v32 = vsel %vm76_vm11, 1.0, %v357_v19  ;;  %v798_v36 = vsel %vm78_vm12, 1.0, %v359_v20  ;;  %vm1074_vm11 = vcmp.eq.f32.partialorder %v697_v59, %v686_v54  ;;  %vm79_vm12 = vcmp.gt.f32.partialorder %v739_v11, %v667_v40 }
  0x7e   :  { %v682_v51 = vpop.permute.xlu1 %570  ;;  %v600_v23 = vpop.permute.xlu2 %599 }
  0x7f   :  { %v572_v17 = vunpack.i.l.bf16 %v682_v51  ;;  %v573_v24 = vunpack.i.h.bf16 %v682_v51  ;;  %v601_v34 = vunpack.i.l.bf16 %v600_v23  ;;  %v602_v37 = vunpack.i.h.bf16 %v600_v23 }
  0x80   :  { %v559_v53 = vpop.permute.xlu0 %558  ;;  %v30_v51 = vrot.slane %v686_v54, 3  ;;  %v868_v23 = vperm.slane %v686_v54, 0 }
  0x81   :  { %v560_v63 = vunpack.i.l.bf16 %v559_v53  ;;  %v561_v0 = vunpack.i.h.bf16 %v559_v53  ;;  %v352_v31 = vsel %vm103_vm7, %v572_v17, 0.0  ;;  %v354_v38 = vsel %vm105_vm13, %v573_v24, 0.0 }
  0x82   :  { %vm82_vm7 = vcmp.gt.f32.partialorder %v747_v13, %v686_v54  ;;  %v384_v42 = vsel %vm71_vm0, 1.0, %v352_v31  ;;  %v451_v53 = vmul.f32 %v389_v32, %v671_v44  ;;  %v363_v57 = vsel %vm114_vm14, %v602_v37, 0.0 }
  0x83   :  { %v349_v5 = vsel %vm100_vm9, %v560_v63, 0.0  ;;  %v351_v8 = vsel %vm102_vm10, %v561_v0, 0.0  ;;  %vm73_vm9 = vcmp.gt.f32.partialorder %v697_v59, %v667_v40  ;;  %vm74_vm10 = vcmp.gt.f32.partialorder %v697_v59, %v686_v54 }
  0x84   :  { %v381_v14 = vsel %vm68_vm6, 1.0, %v349_v5  ;;  %v383_v18 = vsel %vm70_vm8, 1.0, %v351_v8  ;;  %vm69_vm6 = vcmp.gt.f32.partialorder %v691_v56, %v667_v40  ;;  %vm112_vm8 = vcmp.eq.f32.partialorder %v739_v11, %v686_v54 }
  0x85   :  { %v443_v25 = vmul.f32 %v381_v14, %v689_v55  ;;  %v445_v27 = vmul.f32 %v383_v18, %v691_v56  ;;  %v427_v35 = vadd.f32 %v383_v18, %v381_v14  ;;  %v361_v49 = vsel %vm112_vm8, %v601_v34, 0.0 }
  0x86   :  { %v386_v58 = vsel %vm73_vm9, 1.0, %v354_v38  ;;  %v446_v44 = vmul.f32 %v384_v42, %v684_v52  ;;  %v393_v0 = vsel %vm80_vm15, 1.0, %v361_v49  ;;  %vm111_vm13 = vcmp.eq.f32.partialorder %v739_v11, %v667_v40 }
  0x87   :  { %v489_v43 = vadd.f32 %v445_v27, %v443_v25  ;;  %v844_v5 = vsel %vm82_vm7, 1.0, %v363_v57  ;;  %v848_v8 = vperm.slane %v30_v51, 0  ;;  %vm113_vm0 = vcmp.eq.f32.partialorder %v747_v13, %v667_v40 }
  0x88   :  { %v31_v17 = vrot.slane %v686_v54, 4  ;;  %v859_v19 = vmul.f32 %v844_v5, %v747_v13  ;;  %vm83_vm9 = vcmp.gt.f32.partialorder %v868_v23, %v667_v40  ;;  %vm84_vm15 = vcmp.gt.f32.partialorder %v868_v23, %v686_v54 }
  0x8e   :  { %v583_v7 = vpop.permute.xlu1 %582  ;;  %v617_v1 = vpop.permute.xlu2 %616 }
  0x8f   :  { %v584_v10 = vunpack.i.l.bf16 %v583_v7  ;;  %v585_v28 = vunpack.i.h.bf16 %v583_v7  ;;  %v846_v7 = vperm.slane %v29_v50, 0  ;;  %v619_v20 = vunpack.i.h.bf16 %v617_v1 }
  0x90   :  { %v565_v12 = vpop.permute.xlu0 %564 }
  0x91   :  { %v567_v15 = vunpack.i.h.bf16 %v565_v12  ;;  %v566_v16 = vunpack.i.l.bf16 %v565_v12  ;;  %v353_v21 = vsel %vm104_vm2, %v584_v10, 0.0  ;;  %v355_v46 = vsel %vm1074_vm11, %v585_v28, 0.0 }
  0x92   :  { %v385_v33 = vsel %vm72_vm1, 1.0, %v353_v21  ;;  %v387_v60 = vsel %vm74_vm10, 1.0, %v355_v46  ;;  %v28_v12 = vrot.slane %v686_v54, 1  ;;  %v618_v21 = vunpack.i.l.bf16 %v617_v1 }
  0x93   :  { %v348_v22 = vsel %vm99_vm4, %v566_v16, 0.0  ;;  %v350_v26 = vsel %vm101_vm5, %v567_v15, 0.0  ;;  %v447_v47 = vmul.f32 %v385_v33, %v684_v52  ;;  %v448_v52 = vmul.f32 %v386_v58, %v697_v59 }
  0x94   :  { %v380_v29 = vsel %vm67_vm3, 1.0, %v348_v22  ;;  %v382_v30 = vsel %vm69_vm6, 1.0, %v350_v26  ;;  %v449_v10 = vmul.f32 %v387_v60, %v697_v59  ;;  %v455_v15 = vmul.f32 %v393_v0, %v739_v11 }
  0x95   :  { %v442_v39 = vmul.f32 %v380_v29, %v689_v55  ;;  %v444_v41 = vmul.f32 %v382_v30, %v691_v56  ;;  %v412_v48 = vadd.f32 %v382_v30, %v380_v29  ;;  %v453_v55 = vmul.f32 %v798_v36, %v673_v45 }
  0x96   :  { %v428_v56 = vadd.f32 %v427_v35, %v385_v33  ;;  %v490_v45 = vadd.f32 %v489_v43, %v447_v47  ;;  %vm81_vm1 = vcmp.gt.f32.partialorder %v747_v13, %v667_v40  ;;  %vm119_vm2 = vcmp.eq.f32.partialorder %v846_v7, %v667_v40 }
  0x97   :  { %v474_v63 = vadd.f32 %v444_v41, %v442_v39  ;;  %v413_v2 = vadd.f32 %v412_v48, %v384_v42  ;;  %vm121_vm3 = vcmp.eq.f32.partialorder %v848_v8, %v667_v40  ;;  %vm87_vm4 = vcmp.gt.f32.partialorder %v846_v7, %v667_v40  ;;  %v893_v41 = vpop.permute.xlu2 %626 }
  0x98   :  { %v429_v9 = vadd.f32 %v428_v56, %v387_v60  ;;  %v491_v18 = vadd.f32 %v490_v45, %v449_v10  ;;  %v605_v59 = vpop.permute.xlu0 %604  ;;  %vm89_vm5 = vcmp.gt.f32.partialorder %v848_v8, %v667_v40  ;;  %v874_v25 = vperm.slane %v28_v12, 0 }
  0x99   :  { %v475_v14 = vadd.f32 %v474_v63, %v446_v44  ;;  %v414_v22 = vadd.f32 %v413_v2, %v386_v58  ;;  %v32_v28 = vrot.slane %v686_v54, 5  ;;  %v880_v29 = vperm.slane %v31_v17, 0 }
  0x9a   :  { %v430_v24 = vadd.f32 %v429_v9, %v389_v32  ;;  %v492_v30 = vadd.f32 %v491_v18, %v451_v53  ;;  %v368_v31 = vsel %vm119_vm2, %v618_v21, 0.0  ;;  %v370_v32 = vsel %vm121_vm3, %v619_v20, 0.0 }
  0x9b   :  { %v476_v26 = vadd.f32 %v475_v14, %v448_v52  ;;  %v606_v33 = vunpack.i.l.bf16 %v605_v59  ;;  %v415_v35 = vadd.f32 %v414_v22, %v699_v61  ;;  %vm115_vm10 = vcmp.eq.f32.partialorder %v868_v23, %v667_v40 }
  0x9c   :  { %v431_v37 = vadd.f32 %v430_v24, %v798_v36  ;;  %v607_v39 = vunpack.i.h.bf16 %v605_v59  ;;  %vm85_vm6 = vcmp.gt.f32.partialorder %v874_v25, %v667_v40  ;;  %v899_v42 = vsel %vm87_vm4, 1.0, %v368_v31 }
  0x9d   :  { %v477_v61 = vadd.f32 %v476_v26, %v723_v3  ;;  %v904_v36 = vsel %vm89_vm5, 1.0, %v370_v32  ;;  %vm117_vm8 = vcmp.eq.f32.partialorder %v874_v25, %v667_v40  ;;  %v493_v43 = vadd.f32 %v492_v30, %v453_v55 }
  0x9e   :  { %v589_v6 = vpop.permute.xlu1 %588  ;;  %v364_v46 = vsel %vm115_vm10, %v606_v33, 0.0  ;;  %v908_v47 = vperm.slane %v32_v28, 0  ;;  %vm123_vm14 = vcmp.eq.f32.partialorder %v880_v29, %v667_v40  ;;  %v416_v48 = vadd.f32 %v415_v35, %v701_v62 }
  0x9f   :  { %v590_v16 = vunpack.i.l.bf16 %v589_v6  ;;  %v591_v34 = vunpack.i.h.bf16 %v589_v6  ;;  %v628_v50 = vunpack.i.l.bf16 %v893_v41  ;;  %v432_v51 = vadd.f32 %v431_v37, %v393_v0 }
  0xa0   :  { %v920_v53 = vmul.f32 %v899_v42, %v846_v7  ;;  %v924_v55 = vmul.f32 %v904_v36, %v848_v8  ;;  %v366_v56 = vsel %vm117_vm8, %v607_v39, 0.0  ;;  %v478_v58 = vadd.f32 %v477_v61, %v727_v4 }
  0xa1   :  { %v360_v27 = vsel %vm111_vm13, %v590_v16, 0.0  ;;  %v362_v3 = vsel %vm113_vm0, %v591_v34, 0.0  ;;  %v396_v62 = vsel %vm83_vm9, 1.0, %v364_v46  ;;  %v494_v60 = vadd.f32 %v493_v43, %v455_v15 }
  0xa2   :  { %v392_v38 = vsel %vm79_vm12, 1.0, %v360_v27  ;;  %v394_v63 = vsel %vm81_vm1, 1.0, %v362_v3  ;;  %vm86_vm7 = vcmp.gt.f32.partialorder %v874_v25, %v686_v54  ;;  %v398_v4 = vsel %vm85_vm6, 1.0, %v366_v56 }
  0xa3   :  { %v454_v49 = vmul.f32 %v392_v38, %v739_v11  ;;  %v417_v57 = vadd.f32 %v416_v48, %v392_v38  ;;  %v629_v11 = vunpack.i.h.bf16 %v893_v41  ;;  %v944_v45 = vsel %vm123_vm14, %v628_v50, 0.0 }
  0xa4   :  { %vm116_vm11 = vcmp.eq.f32.partialorder %v868_v23, %v686_v54  ;;  %v433_v1 = vadd.f32 %v432_v51, %v844_v5  ;;  %v458_v2 = vmul.f32 %v396_v62, %v868_v23  ;;  %v456_v10 = vmul.f32 %v394_v63, %v747_v13 }
  0xa5   :  { %v479_v44 = vadd.f32 %v478_v58, %v454_v49  ;;  %v418_v9 = vadd.f32 %v417_v57, %v394_v63  ;;  %vm118_vm12 = vcmp.eq.f32.partialorder %v874_v25, %v686_v54  ;;  %v33_v12 = vrot.slane %v686_v54, 6 }
  0xa6   :  { %v495_v14 = vadd.f32 %v494_v60, %v859_v19  ;;  %v460_v15 = vmul.f32 %v398_v4, %v874_v25  ;;  %vm125_vm13 = vcmp.eq.f32.partialorder %v908_v47, %v667_v40  ;;  %vm88_vm0 = vcmp.gt.f32.partialorder %v846_v7, %v686_v54 }
  0xa7   :  { %v480_v17 = vadd.f32 %v479_v44, %v456_v10  ;;  %vm90_vm1 = vcmp.gt.f32.partialorder %v848_v8, %v686_v54  ;;  %v34_v18 = vrot.slane %v686_v54, 7  ;;  %vm91_vm2 = vcmp.gt.f32.partialorder %v880_v29, %v667_v40 }
  0xa8   :  { %v633_v16 = vpop.permute.xlu0 %632  ;;  %vm120_vm3 = vcmp.eq.f32.partialorder %v846_v7, %v686_v54  ;;  %vm122_vm4 = vcmp.eq.f32.partialorder %v848_v8, %v686_v54  ;;  %v419_v21 = vadd.f32 %v418_v9, %v396_v62  ;;  %vm92_vm5 = vcmp.gt.f32.partialorder %v880_v29, %v686_v54 }
  0xa9   :  { %v634_v22 = vunpack.i.l.bf16 %v633_v16  ;;  %v975_v59 = vperm.slane %v33_v12, 0  ;;  %vm94_vm9 = vcmp.gt.f32.partialorder %v908_v47, %v686_v54  ;;  %vm124_vm10 = vcmp.eq.f32.partialorder %v880_v29, %v686_v54 }
  0xaa   :  { %vm126_vm6 = vcmp.eq.f32.partialorder %v908_v47, %v686_v54  ;;  %v481_v26 = vadd.f32 %v480_v17, %v458_v2  ;;  %v986_v31 = vperm.slane %v34_v18, 0  ;;  %vm93_vm8 = vcmp.gt.f32.partialorder %v908_v47, %v667_v40 }
  0xab   :  { %v635_v35 = vunpack.i.h.bf16 %v633_v16  ;;  %v420_v37 = vadd.f32 %v419_v21, %v398_v4  ;;  %v373_v38 = vsel %vm124_vm10, %v634_v22, 0.0  ;;  %vm128_vm14 = vcmp.eq.f32.partialorder %v975_v59, %v686_v54 }
  0xac   :  { %v482_v48 = vadd.f32 %v481_v26, %v460_v15  ;;  %v374_v58 = vsel %vm125_vm13, %v629_v11, 0.0  ;;  %v405_v62 = vsel %vm92_vm5, 1.0, %v373_v38  ;;  %v404_v11 = vsel %vm91_vm2, 1.0, %v944_v45 }
  0xad   :  { %v375_v57 = vsel %vm126_vm6, %v635_v35, 0.0  ;;  %v421_v60 = vadd.f32 %v420_v37, %v899_v42  ;;  %v467_v2 = vmul.f32 %v405_v62, %v880_v29  ;;  %v406_v9 = vsel %vm93_vm8, 1.0, %v374_v58 }
  0xae   :  { %v611_v0 = vpop.permute.xlu1 %610  ;;  %v407_v4 = vsel %vm94_vm9, 1.0, %v375_v57  ;;  %v466_v10 = vmul.f32 %v404_v11, %v880_v29  ;;  %v468_v17 = vmul.f32 %v406_v9, %v908_v47  ;;  %vm127_vm13 = vcmp.eq.f32.partialorder %v975_v59, %v667_v40 }
  0xaf   :  { %v613_v6 = vunpack.i.h.bf16 %v611_v0  ;;  %v612_v52 = vunpack.i.l.bf16 %v611_v0  ;;  %v483_v0 = vadd.f32 %v482_v48, %v920_v53  ;;  %v422_v45 = vadd.f32 %v421_v60, %v904_v36 }
  0xb0   :  { %v469_v15 = vmul.f32 %v407_v4, %v908_v47 }
  0xb1   :  { %v365_v5 = vsel %vm116_vm11, %v612_v52, 0.0  ;;  %v367_v19 = vsel %vm118_vm12, %v613_v6, 0.0  ;;  %vm98_vm11 = vcmp.gt.f32.partialorder %v986_v31, %v686_v54  ;;  %v423_v16 = vadd.f32 %v422_v45, %v404_v11 }
  0xb2   :  { %v397_v13 = vsel %vm84_vm15, 1.0, %v365_v5  ;;  %v399_v27 = vsel %vm86_vm7, 1.0, %v367_v19  ;;  %vm130_vm15 = vcmp.eq.f32.partialorder %v986_v31, %v686_v54  ;;  %vm96_vm7 = vcmp.gt.f32.partialorder %v975_v59, %v686_v54 }
  0xb3   :  { %v459_v20 = vmul.f32 %v397_v13, %v868_v23  ;;  %v434_v24 = vadd.f32 %v433_v1, %v397_v13  ;;  %v645_v23 = vpop.permute.xlu2 %644  ;;  %v461_v43 = vmul.f32 %v399_v27, %v874_v25  ;;  %vm95_vm12 = vcmp.gt.f32.partialorder %v975_v59, %v667_v40 }
  0xb4   :  { %v647_v30 = vunpack.i.h.bf16 %v645_v23  ;;  %v646_v39 = vunpack.i.l.bf16 %v645_v23  ;;  %v424_v47 = vadd.f32 %v423_v16, %v406_v9 }
  0xb5   :  { %v496_v32 = vadd.f32 %v495_v14, %v459_v20  ;;  %v435_v61 = vadd.f32 %v434_v24, %v399_v27  ;;  %v484_v14 = vadd.f32 %v483_v0, %v924_v55 }
  0xb6   :  { %v622_v28 = vpop.permute.xlu1 %621  ;;  %v379_v42 = vsel %vm130_vm15, %v647_v30, 0.0 }
  0xb7   :  { %v624_v33 = vunpack.i.h.bf16 %v622_v28  ;;  %v623_v34 = vunpack.i.l.bf16 %v622_v28  ;;  %v497_v25 = vadd.f32 %v496_v32, %v461_v43  ;;  %v411_v12 = vsel %vm98_vm11, 1.0, %v379_v42 }
  0xb8   :  { %v485_v29 = vadd.f32 %v484_v14, %v466_v10  ;;  %v473_v23 = vmul.f32 %v411_v12, %v986_v31 }
  0xb9   :  { %v369_v46 = vsel %vm120_vm3, %v623_v34, 0.0  ;;  %v371_v3 = vsel %vm122_vm4, %v624_v33, 0.0 }
  0xba   :  { %v401_v49 = vsel %vm88_vm0, 1.0, %v369_v46  ;;  %v403_v50 = vsel %vm90_vm1, 1.0, %v371_v3  ;;  %vm129_vm0 = vcmp.eq.f32.partialorder %v986_v31, %v667_v40  ;;  %vm97_vm1 = vcmp.gt.f32.partialorder %v986_v31, %v667_v40 }
  0xbb   :  { %v436_v51 = vadd.f32 %v435_v61, %v401_v49  ;;  %v463_v56 = vmul.f32 %v401_v49, %v846_v7  ;;  %v377_v7 = vsel %vm128_vm14, %v646_v39, 0.0  ;;  %v465_v41 = vmul.f32 %v403_v50, %v848_v8 }
  0xbc   :  { %v409_v6 = vsel %vm96_vm7, 1.0, %v377_v7  ;;  %v486_v27 = vadd.f32 %v485_v29, %v468_v17 }
  0xbd   :  { %v437_v63 = vadd.f32 %v436_v51, %v403_v50  ;;  %v498_v44 = vadd.f32 %v497_v25, %v463_v56  ;;  %v471_v36 = vmul.f32 %v409_v6, %v975_v59 }
  0xbf   :  { %v499_v8 = vadd.f32 %v498_v44, %v465_v41  ;;  %v438_v1 = vadd.f32 %v437_v63, %v405_v62 }
  0xc1   :  { %v439_v52 = vadd.f32 %v438_v1, %v407_v4  ;;  %v500_v53 = vadd.f32 %v499_v8, %v467_v2 }
  0xc3   :  { %v440_v5 = vadd.f32 %v439_v52, %v409_v6  ;;  %v501_v55 = vadd.f32 %v500_v53, %v469_v15 }
  0xc5   :  { %v441_v13 = vadd.f32 %v440_v5, %v411_v12  ;;  %v502_v28 = vadd.f32 %v501_v55, %v471_v36 }
  0xc6   :  { %v639_v18 = vpop.permute.xlu1 %638 }
  0xc7   :  { %v641_v19 = vunpack.i.h.bf16 %v639_v18  ;;  %v640_v20 = vunpack.i.l.bf16 %v639_v18  ;;  %v505_v21 = vmul.f32 %v441_v13, %v686_v54  ;;  %v503_v38 = vadd.f32 %v502_v28, %v473_v23 }
  0xc9   :  { %v376_v22 = vsel %vm127_vm13, %v640_v20, 0.0  ;;  %v378_v24 = vsel %vm129_vm0, %v641_v19, 0.0  ;;  %v507_v34 = vadd.f32 1.0, %v505_v21 }
  0xca   :  { %v408_v26 = vsel %vm95_vm12, 1.0, %v376_v22  ;;  %v410_v33 = vsel %vm97_vm1, 1.0, %v378_v24 }
  0xcb   :  { %v425_v30 = vadd.f32 %v424_v47, %v408_v26  ;;  %v470_v32 = vmul.f32 %v408_v26, %v975_v59  ;;  %v472_v39 = vmul.f32 %v410_v33, %v986_v31  ;;  %vm509_vm2 = vcmp.gt.f32.partialorder %v507_v34, %v503_v38 }
  0xcc   :  { %v511_v3 = vsel %vm509_vm2, %v441_v13, 0.0  ;;  %v520_v50 = vsel %vm509_vm2, %v686_v54, 0.0 }
  0xcd   :  { %v426_v35 = vadd.f32 %v425_v30, %v410_v33  ;;  %v487_v37 = vadd.f32 %v486_v27, %v470_v32 }
  0xcf   :  { %v504_v61 = vmul.f32 %v426_v35, %v667_v40  ;;  %v488_v43 = vadd.f32 %v487_v37, %v472_v39 }
  0xd1   :  { %v506_v46 = vadd.f32 1.0, %v504_v61 }
  0xd3   :  { %vm508_vm3 = vcmp.gt.f32.partialorder %v506_v46, %v488_v43 }
  0xd4   :  { %v510_v48 = vsel %vm508_vm3, %v426_v35, 0.0  ;;  %v519_v49 = vsel %vm508_vm3, %v667_v40, 0.0 }
  0xd5   :  { %v512_v59 = vmax.f32 %v510_v48, %v511_v3  ;;  %v521_v25 = vadd.f32 %v520_v50, %v519_v49 }
  0xd7   :  { %v513_v51 = vrot.slane %v512_v59, 4  ;;  %v522_v57 = vrot.slane %v521_v25, 4 }
  0xd9   :  { %v514_v56 = vmax.f32 %v512_v59, %v513_v51  ;;  %v523_v31 = vadd.f32 %v522_v57, %v521_v25 }
  0xdb   :  { %v515_v58 = vrot.slane %v514_v56, 2  ;;  %v524_v63 = vrot.slane %v523_v31, 2 }
  0xdd   :  { %v516_v62 = vmax.f32 %v514_v56, %v515_v58  ;;  %v525_v41 = vadd.f32 %v524_v63, %v523_v31 }
  0xdf   :  { %v517_v7 = vrot.slane %v516_v62, 1  ;;  %v526_v11 = vrot.slane %v525_v41, 1 }
  0xe1   :  { %v518_v60 = vmax.f32 %v516_v62, %v517_v7  ;;  %v527_v8 = vadd.f32 %v526_v11, %v525_v41 }
  0xe3   :  { %648 = vrcp.f32 %v518_v60  ;;  %v540_v0 = vand.u32 2147483648, %v518_v60  ;;  %v538_v2 = vand.u32 2147483647, %v518_v60  ;;  %vm534_vm5 = vweird.f32 %v518_v60 }
  0xe4   :  { %v554_v52 = vadd.f32 -1.0, %v527_v8 }
  0xe5   :  { %v541_v45 = vor.u32 1.1754944e-38, %v540_v0  ;;  %vm539_vm10 = vcmp.eq.f32.partialorder %v538_v2, 8.507059e+37 }
  0xe9   :  { %v649_v44 = vpop.eup %648 }
  0xea   :  { %v530_v4 = vmul.f32 %v649_v44, %v518_v60  ;;  %vm535_vm4 = vweird.f32 %v649_v44 }
  0xeb   :  { %vm536_vm9 = vmor %vm534_vm5, %vm535_vm4 }
  0xec   :  { %v531_v42 = vsub.f32 1.0, %v530_v4 }
  0xee   :  { %v532_v1 = vmul.f32 %v649_v44, %v531_v42 }
  0xf0   :  { %v533_v6 = vadd.f32 %v649_v44, %v532_v1 }
  0xf2   :  { %v537_v9 = vsel %vm536_vm9, %v649_v44, %v533_v6 }
  0xf3   :  { %v542_v10 = vsel %vm539_vm10, %v541_v45, %v537_v9 }
  0xf4   :  { %v543_v12 = vmul.f32 %v554_v52, %v542_v10 }
  0xf6   :  { %v544_v14 = vsub.f32 %v667_v40, %v543_v12  ;;  %v545_v15 = vsub.f32 %v686_v54, %v543_v12 }
  0xf8   :  { %v546_v53 = vmax.f32 %v544_v14, 0.0  ;;  %v547_v5 = vmax.f32 %v545_v15, 0.0 }
  0xfa   :  { %548 = vst [vmem:[%s1073_s1] sm:$0xff] %v546_v53 }
  0xfb   :  { %549 = vst [vmem:[%s1073_s1 + $0x8] sm:$0xff] %v547_v5 }

</bundles_post_ra>
